<compile_context>
chip_gen: v7x
topology: tpu7x:2x2x1
jax: 0.10.0
libtpu: 0.0.40
codegen_flags: <defaults>
</compile_context>

<pallas_src>
import functools

import jax
import jax.numpy as jnp
import numpy as np
from jax.experimental import pallas as pl
from jax.experimental.pallas import tpu as pltpu


# ----------------------------------------------------------------------------- kernels

def _conv1x1_bn_kernel(x_ref, w_ref, shift_ref, o_ref, *, mm_dtype):
    """stride == 1: one lane-dense spatial tile.

    x_ref:     (1, C, thw)   pre-ReLU input tile (channels on sublanes, H*W on lanes)
    w_ref:     (tco, C)      BN-scale-folded conv weight, PyTorch (C_out, C_in) layout
    shift_ref: (tco, 1)      folded BN shift (beta - mean * scale)
    o_ref:     (1, tco, thw)
    """
    x = jnp.maximum(x_ref[0], 0.0)                              # ReLU on the VPU, f32
    y = jnp.dot(w_ref[...], x.astype(mm_dtype),                 # MXU; bf16 operands default
                preferred_element_type=jnp.float32)
    o_ref[0] = (y + shift_ref[...]).astype(o_ref.dtype)


def _conv1x1_bn_strided_kernel(x_ref, w_ref, shift_ref, sel_ref, o_ref, *,
                               stride, tg, mm_dtype):
    """stride > 1: tg output rows per grid step, subsampled in-kernel (no pre-pass).

    x_ref:     (1, C, th_in, W)  full-resolution input rows covering tg output rows
    w_ref:     (tco, C)
    shift_ref: (tco, 1)
    sel_ref:   (W, Wo)           exact 0/1 column-selection matrix (W-stride)
    o_ref:     (1, tco, tg, Wo)
    """
    w = w_ref[...]
    sel = sel_ref[...]
    shift = shift_ref[...]
    for i in range(tg):                                         # static unroll over rows
        # H-stride: row i*stride of this block is output row i of the tile.
        xr = jnp.maximum(x_ref[0, :, i * stride, :], 0.0)       # (C, W), ReLU in f32
        # W-stride: exact 0/1 selection matmul on the MXU (avoids lane-strided gathers).
        xs = jnp.dot(xr.astype(mm_dtype), sel,
                     preferred_element_type=jnp.float32)        # (C, Wo)
        y = jnp.dot(w, xs.astype(mm_dtype),
                    preferred_element_type=jnp.float32)         # (tco, Wo)
        o_ref[0, :, i, :] = (y + shift).astype(o_ref.dtype)
    # Ragged row tiles: stale rows only feed their own (masked) output rows, so no
    # sanitization is needed.


# ----------------------------------------------------------------------------- sizing

def _vmem_limit_bytes():
    """Generation-aware VMEM request: ~48 MiB on v7x (64 MiB/TC), ~96 MiB on v5e/v6e."""
    try:
        cap = int(getattr(pltpu.get_tpu_info(), "vmem_capacity_bytes", 128 << 20))
    except Exception:
        cap = 128 << 20
    return int(min(cap * 3 // 4, 96 << 20))


def _pick_cout_tile(c, mm_bytes, max_w_bytes=8 << 20):
    """Tile C_out only when the folded weight would otherwise hog VMEM (large C)."""
    tco = c
    while tco > 256 and tco % 2 == 0 and tco * c * mm_bytes > max_w_bytes:
        tco //= 2
    if tco != c and (c % tco != 0 or tco % 8 != 0):
        tco = c
    return tco


def _pick_hw_tile(hw, c, tco, x_bytes, out_bytes, w_resident_bytes, vmem_limit):
    """Largest 128-multiple lane tile s.t. 2*in + 2*out tiles + weight fit the budget."""
    budget = max(vmem_limit - w_resident_bytes - (6 << 20), 2 << 20)
    per_lane = 2 * c * x_bytes + 2 * tco * out_bytes
    thw = max(128, (budget // per_lane) // 128 * 128)
    if thw >= hw:
        thw = hw            # single full-row block: always legal, no masked tail
    return thw


def _shrink_for_grid(thw, hw, outer_steps, min_steps=8):
    """Keep >= ~8 grid steps so v7x can shard the parallel grid across its 2 TCs."""
    while thw > 128 and outer_steps * pl.cdiv(hw, thw) < min_steps:
        thw = max(128, (thw // 2) // 128 * 128)
    return thw


def _const_operand_spec(shape, index_map, nbytes):
    """Grid-constant operand; single-buffer it once it is big enough to matter."""
    if nbytes >= (1 << 20):
        try:
            return pl.BlockSpec(shape, index_map, pipeline_mode=pl.Buffered(1))
        except TypeError:   # BlockSpec without pipeline_mode support
            pass
    return pl.BlockSpec(shape, index_map)


# ----------------------------------------------------------------------------- wrapper

def conv1x1_forward(x_nchw, weight, bn_scale, bn_shift, *, stride=1,
                    matmul_dtype=jnp.bfloat16):
    """ReLU -> 1x1 Conv (no bias, stride s) -> BatchNorm (inference form).

    x_nchw: (N, C, H, W).  weight: (C_out, C_in) = (C, C), PyTorch layout.
    Returns (N, C, Ho, Wo) in x_nchw.dtype.
    """
    n, c, h, w = x_nchw.shape
    out_dtype = x_nchw.dtype
    x_bytes = np.dtype(x_nchw.dtype).itemsize
    out_bytes = np.dtype(out_dtype).itemsize
    mm_bytes = np.dtype(matmul_dtype).itemsize

    # Fold the per-output-channel BN scale into the conv weight; shift stays separate.
    w_scaled = (bn_scale[:, None] * weight).astype(matmul_dtype)
    shift2d = bn_shift.reshape(c, 1).astype(jnp.float32)

    vmem_limit = _vmem_limit_bytes()
    tco = _pick_cout_tile(c, mm_bytes)
    co_tiles = c // tco

    # Constant-index operands: DMA'd once, stay resident (single-buffered when large).
    w_spec = _const_operand_spec((tco, c), lambda co, nn, j: (co, 0),
                                 tco * c * mm_bytes)
    shift_spec = pl.BlockSpec((tco, 1), lambda co, nn, j: (co, 0))

    if stride == 1:
        hw = h * w
        x3 = x_nchw.reshape(n, c, hw)                 # free reshape, no transpose
        thw = _pick_hw_tile(hw, c, tco, x_bytes, out_bytes,
                            2 * tco * c * mm_bytes, vmem_limit)
        thw = _shrink_for_grid(thw, hw, n * co_tiles)
        grid = (co_tiles, n, pl.cdiv(hw, thw))

        cost = pl.CostEstimate(
            flops=int(2 * n * hw * c * c),
            transcendentals=0,
            bytes_accessed=int(n * c * hw * (x_bytes + out_bytes)
                               + c * c * mm_bytes + c * 4),
        )
        kernel = functools.partial(_conv1x1_bn_kernel, mm_dtype=matmul_dtype)
        out3 = pl.pallas_call(
            kernel,
            out_shape=jax.ShapeDtypeStruct((n, c, hw), out_dtype),
            grid_spec=pltpu.PrefetchScalarGridSpec(
                num_scalar_prefetch=0,
                grid=grid,
                in_specs=[
                    pl.BlockSpec((1, c, thw), lambda co, nn, j: (nn, 0, j)),
                    w_spec,
                    shift_spec,
                ],
                out_specs=pl.BlockSpec((1, tco, thw), lambda co, nn, j: (nn, co, j)),
            ),
            compiler_params=pltpu.CompilerParams(
                dimension_semantics=("parallel", "parallel", "parallel"),
                vmem_limit_bytes=vmem_limit,
            ),
            cost_estimate=cost,
        )(x3, w_scaled, shift2d)
        return out3.reshape(n, c, h, w)

    # ---------------- stride > 1: in-kernel subsample, single HBM pass ----------------
    ho = (h - 1) // stride + 1
    wo = (w - 1) // stride + 1

    # 8 output rows per grid step when possible (amortizes ~0.35us/step overhead and
    # keeps block dims 8-aligned or full); otherwise all rows in one block.
    if ho > 8 and 8 * stride <= h:
        tg, th_in = 8, 8 * stride
    else:
        tg, th_in = ho, h

    need = (2 * c * th_in * w * x_bytes + 2 * tco * tg * wo * out_bytes
            + 2 * tco * c * mm_bytes + (8 << 20))
    if need > vmem_limit:
        # TODO(synk): tile C_in with an accumulator instead of this rare fallback
        # (only triggers for very large C * W strided layers).
        return conv1x1_forward(x_nchw[:, :, ::stride, ::stride], weight, bn_scale,
                               bn_shift, stride=1, matmul_dtype=matmul_dtype)

    # Exact 0/1 W-selection matrix: output column wo <- input column wo*stride.
    sel = (jnp.arange(w)[:, None] == (jnp.arange(wo) * stride)[None, :]
           ).astype(matmul_dtype)

    grid = (co_tiles, n, pl.cdiv(ho, tg))
    cost = pl.CostEstimate(
        flops=int(2 * n * ho * (c * w * wo + c * c * wo)),
        transcendentals=0,
        bytes_accessed=int(n * c * h * w * x_bytes + n * c * ho * wo * out_bytes
                           + c * c * mm_bytes + w * wo * mm_bytes),
    )
    kernel = functools.partial(_conv1x1_bn_strided_kernel,
                               stride=stride, tg=tg, mm_dtype=matmul_dtype)
    out = pl.pallas_call(
        kernel,
        out_shape=jax.ShapeDtypeStruct((n, c, ho, wo), out_dtype),
        grid_spec=pltpu.PrefetchScalarGridSpec(
            num_scalar_prefetch=0,
            grid=grid,
            in_specs=[
                pl.BlockSpec((1, c, th_in, w), lambda co, nn, j: (nn, 0, j, 0)),
                w_spec,
                shift_spec,
                pl.BlockSpec((w, wo), lambda co, nn, j: (0, 0)),
            ],
            out_specs=pl.BlockSpec((1, tco, tg, wo), lambda co, nn, j: (nn, co, j, 0)),
        ),
        compiler_params=pltpu.CompilerParams(
            dimension_semantics=("parallel", "parallel", "parallel"),
            vmem_limit_bytes=vmem_limit,
        ),
        cost_estimate=cost,
    )(x_nchw, w_scaled, shift2d, sel)
    # TODO(synk): output lane width is Wo (<128 for small images) -> masked stores;
    # packing several output rows onto the lane axis would make the store lane-dense.
    return out


# ----------------------------------------------------------------------------- testing

def _reference(x, weight, bn_scale, bn_shift, stride):
    xs = x[:, :, ::stride, ::stride]
    r = jnp.einsum("nchw,oc->nohw", jnp.maximum(xs, 0.0), weight)
    return r * bn_scale[None, :, None, None] + bn_shift[None, :, None, None]


if __name__ == "__main__":
    key = jax.random.PRNGKey(0)
    N, C, H, W = 2, 4, 16, 16

    kx, kw = jax.random.split(key)
    x = jax.random.normal(kx, (N, C, H, W), dtype=jnp.float32)

    # Conv2d(C, C, 1, bias=False) weight, PyTorch (C_out, C_in, 1, 1) -> (C, C).
    fan_in = C
    bound = 1.0 / (fan_in ** 0.5)
    weight = jax.random.uniform(kw, (C, C), minval=-bound, maxval=bound,
                                dtype=jnp.float32)

    # BatchNorm2d(C, affine=True) fresh init, inference form.
    eps = 1e-5
    gamma = jnp.ones((C,), jnp.float32)
    beta = jnp.zeros((C,), jnp.float32)
    running_mean = jnp.zeros((C,), jnp.float32)
    running_var = jnp.ones((C,), jnp.float32)
    bn_scale = gamma / jnp.sqrt(running_var + eps)
    bn_shift = beta - running_mean * bn_scale

    for stride in (1, 2):
        ref = _reference(x, weight, bn_scale, bn_shift, stride)

        # Bit-exact path (f32 MXU operands).
        out_f32 = conv1x1_forward(x, weight, bn_scale, bn_shift, stride=stride,
                                  matmul_dtype=jnp.float32)
        jax.block_until_ready(out_f32)
        assert out_f32.shape == ref.shape
        assert jnp.allclose(out_f32, ref, atol=1e-5, rtol=1e-5)

        # Default path (bf16 MXU operands, f32 accumulate) -> looser tolerance.
        out_bf16 = conv1x1_forward(x, weight, bn_scale, bn_shift, stride=stride)
        jax.block_until_ready(out_bf16)
        assert out_bf16.shape == ref.shape
        assert jnp.allclose(out_bf16, ref, atol=1e-1, rtol=5e-2)

    print("KERNEL_OK")
</pallas_src>

<mosaic_0001>
module attributes {stable_mosaic.version = 11 : i64} {
  func.func @_conv1x1_bn_kernel(%arg0: i32, %arg1: i32, %arg2: i32, %arg3: memref<1x4x128xf32, #tpu.memory_space<vmem>>, %arg4: memref<4x4xf32, #tpu.memory_space<vmem>>, %arg5: memref<4x1xf32, #tpu.memory_space<vmem>>, %arg6: memref<1x4x128xf32, #tpu.memory_space<vmem>>) attributes {dimension_semantics = [#tpu.dimension_semantics<parallel>, #tpu.dimension_semantics<parallel>, #tpu.dimension_semantics<parallel>], iteration_bounds = array<i64: 1, 2, 2>, scalar_prefetch = 0 : i64, scratch_operands = 0 : i64, tpu.core_type = #tpu.core_type<tc>, window_params = [{transform_indices = @transform_0, window_bounds = array<i64: 1, 4, 128>}, {transform_indices = @transform_1, window_bounds = array<i64: 4, 4>}, {transform_indices = @transform_2, window_bounds = array<i64: 4, 1>}, {transform_indices = @transform_3, window_bounds = array<i64: 1, 4, 128>}]} {
    %c0 = arith.constant 0 : index
    %c0_0 = arith.constant 0 : index
    %c0_1 = arith.constant 0 : index
    %0 = vector.load %arg3[%c0, %c0_0, %c0_1] : memref<1x4x128xf32, #tpu.memory_space<vmem>>, vector<1x4x128xf32>
    %1 = vector.shape_cast %0 : vector<1x4x128xf32> to vector<4x128xf32>
    %cst = arith.constant 0.000000e+00 : f32
    %2 = vector.broadcast %cst : f32 to vector<4x128xf32>
    %3 = arith.maximumf %1, %2 : vector<4x128xf32>
    %c0_2 = arith.constant 0 : index
    %c0_3 = arith.constant 0 : index
    %4 = vector.load %arg4[%c0_2, %c0_3] : memref<4x4xf32, #tpu.memory_space<vmem>>, vector<4x4xf32>
    %cst_4 = arith.constant dense<0.000000e+00> : vector<4x128xf32>
    %5 = tpu.matmul %4, %3, %cst_4 {dimension_numbers = #tpu.dot_dimension_numbers<[1], [0], [0], [1], [0, 0, 1, 1], [], []>} : vector<4x4xf32>, vector<4x128xf32>, vector<4x128xf32> -> vector<4x128xf32>
    %c0_5 = arith.constant 0 : index
    %c0_6 = arith.constant 0 : index
    %6 = vector.load %arg5[%c0_5, %c0_6] : memref<4x1xf32, #tpu.memory_space<vmem>>, vector<4x1xf32>
    %7 = vector.broadcast %6 : vector<4x1xf32> to vector<4x128xf32>
    %8 = arith.addf %5, %7 : vector<4x128xf32>
    %c0_7 = arith.constant 0 : index
    %c0_8 = arith.constant 0 : index
    %c0_9 = arith.constant 0 : index
    %9 = vector.load %arg6[%c0_7, %c0_8, %c0_9] : memref<1x4x128xf32, #tpu.memory_space<vmem>>, vector<1x4x128xf32>
    %10 = vector.shape_cast %9 : vector<1x4x128xf32> to vector<4x128xf32>
    %11 = vector.shape_cast %8 : vector<4x128xf32> to vector<1x4x128xf32>
    tpu.vector_store %arg6[%c0_7, %c0_8, %c0_9], %11 {strides = array<i32>} : memref<1x4x128xf32, #tpu.memory_space<vmem>>, vector<1x4x128xf32>,
    return
  }
  func.func @transform_0(%arg0: i32, %arg1: i32, %arg2: i32) -> (i32, i32, i32) {
    %c0_i32 = arith.constant 0 : i32
    %c0_i32_0 = arith.constant 0 : i32
    return %arg1, %c0_i32, %arg2 : i32, i32, i32
  }
  func.func @transform_1(%arg0: i32, %arg1: i32, %arg2: i32) -> (i32, i32) {
    %c0_i32 = arith.constant 0 : i32
    %c0_i32_0 = arith.constant 0 : i32
    return %arg0, %c0_i32 : i32, i32
  }
  func.func @transform_2(%arg0: i32, %arg1: i32, %arg2: i32) -> (i32, i32) {
    %c0_i32 = arith.constant 0 : i32
    %c0_i32_0 = arith.constant 0 : i32
    return %arg0, %c0_i32 : i32, i32
  }
  func.func @transform_3(%arg0: i32, %arg1: i32, %arg2: i32) -> (i32, i32, i32) {
    %c0_i32 = arith.constant 0 : i32
    return %arg1, %arg0, %arg2 : i32, i32, i32
  }
}

</mosaic_0001>

<bundles_post_ra>
// kernel: tpu_custom_call.1
= control target key start
LH: loop header
LB: loop body
LE: loop exit
PB: predicated region body
PF: predicated region fallthrough
CT: control target
= control target key end

     0   :  { %s1088_s0 = inlined_call_operand.hbm [shape: f32[2,4,256], index: 0, kind: input, shape index: {}]   ;;  %s1089_s1 = inlined_call_operand.hbm [shape: f32[4,4], index: 1, kind: input, shape index: {}]   ;;  %s1090_s2 = inlined_call_operand.hbm [shape: f32[4,1], index: 2, kind: input, shape index: {}]   ;;  %s1091_s3 = inlined_call_operand.hbm [shape: f32[2,4,256], index: 3, kind: output, shape index: {}]  }
   0x1   :  { %1098 = sst [smem:[#allocation14_spill]] %s1089_s1 }
   0x2   :  { %1099 = sst [smem:[#allocation15_spill]] %s1090_s2 }
   0x3   :  { %8 = vsyncpa [#allocation3], 0 }
   0x4   :  { %10 = vsyncpa [#allocation3 + $0x1], 0 }
   0x5   :  { %11 = vsyncpa [#allocation6], 0 }
   0x6   :  { %12 = vsyncpa [#allocation4], 0 }
   0x7   :  { %14 = vsyncpa [#allocation4 + $0x1], 0  ;;  %s819_s12 = smov 0   ;;  %s821_s13 = smov 0  }
   0x8   :  { %s823_s14 = smov 0   ;;  %s825_s15 = smov 0  }
   0x9   :  { %s827_s16 = smov 0   ;;  %s829_s17 = smov 0  }
   0xa   :  { %s831_s18 = smov 0   ;;  %s833_s19 = smov 0  }
   0xb LB: > { %s471_s20 = sadd.s32 4294967295, %s790_s19   ;;  %s472_s21 = sadd.s32 4294967294, %s790_s19   ;;  %s790_s19 = sphi %s833_s19, %s20_s19   ;;  %s786_s18 = sphi %s831_s18, %s1124_s18   ;;  %s782_s17 = sphi %s829_s17, %s1123_s17   ;;  %s778_s16 = sphi %s827_s16, %s1122_s16   ;;  %s774_s15 = sphi %s825_s15, %s1121_s15   ;;  %s770_s14 = sphi %s823_s14, %s1120_s14   ;;  %s766_s13 = sphi %s821_s13, %s1119_s13   ;;  %s762_s12 = sphi %s819_s12, %s1118_s12  }
   0xc   : > { %p61_p0 = scmp.ne.s32.totalorder %s766_s13, %s762_s12  ;;  %p865_p1 = scmp.eq.s32.totalorder %s471_s20, 0 }
   0xd   : > { %p147_p2 = scmp.eq.s32.totalorder %s472_s21, 3  ;;  %p473_p4 = scmp.ge.s32.totalorder %s790_s19, 1 }
   0xe   : > { %s1100_s22 = scalar_select %p865_p1, 1, 0 }
   0xf   : > { %p871_p3 = por %p865_p1, %p61_p0  ;;  %p876_p5 = por %p147_p2, %p61_p0 }
  0x10   : > { %p154_p6 = scmp.lt.s32.totalorder %s790_s19, 5  ;;  %s792_s26 = smov [#allocation5]  }
  0x11   : > { %s1101_s23 = scalar_select %p871_p3, 1, 0 }
  0x12   : > { %s1102_s24 = scalar_select %p876_p5, 1, 0 }
  0x13   : > { %p881_p7 = pnand %p473_p4, %p154_p6  ;;  %s169_s27 = sshll.u32 %s792_s26, 4  ;;  %s170_s27 = int_to_ptr.vmem [resolvable:$true] %s169_s27 }
  0x14   : > { %1103 = sst [smem:[#allocation12_spill]] %s1102_s24  ;;  %s793_s28 = smov [#allocation7]  }
  0x15   : > { %s1104_s25 = scalar_select %p881_p7, 1, 0 }
  0x16   : > { %p511_p8 = pneg %p881_p7  ;;  %s182_s29 = sshll.u32 %s793_s28, 4  ;;  %s893_s29 = int_to_ptr.vmem [resolvable:$true] %s182_s29 }
  0x17   : > { %s1106_s1 = sld [smem:[#allocation14_spill]] }
  0x18   : > { %p889_p9 = pnand %p511_p8, %p865_p1 }
  0x1a   : > { %p604_p11 = pneg %p889_p9 }
  0x1d   : > { %s602_s6 = scalar_lea.hbm %s1106_s1, 64 }
  0x1e   : > { %p603_p10 = scmp.ne.s32.totalorder %s1106_s1, %s602_s6  ;;  %p609_p0 = scmp.lt.u32.totalorder %s602_s6, %s1106_s1 }
  0x20   : > { %p605_p12 = pnand %p604_p11, %p603_p10 }
  0x22   : > { %p606_p13 = pneg %p605_p12 }
  0x24   : > { %p611_p2 = pnand %p609_p0, %p606_p13 }
  0x26   : > { %614 = shalt.err (!%p611_p2)
}
  0x27   : > { %s615_s11 = scalar_lea.vmem %s170_s27, 64  ;;  %p623_p5 = scmp.lt.s32.totalorder %s170_s27, %s170_s27 }
  0x28   : > { %p616_p4 = scmp.ne.s32.totalorder %s170_s27, %s615_s11  ;;  %p624_p1 = scmp.lt.s32.totalorder %s615_s11, %s615_s11 }
  0x2a   : > { %p618_p6 = pnand %p616_p4, %p604_p11  ;;  %p625_p3 = por %p624_p1, %p623_p5 }
  0x2c   : > { %p619_p8 = pneg %p618_p6 }
  0x2e   : > { %p626_p7 = pnand %p625_p3, %p619_p8 }
  0x30   : > { %629 = shalt.err (!%p626_p7)
}
  0x31   : > { %514 = dma.hbm_to_vmem [thread:$0]  (!%p889_p9), %s1106_s1, 64, %s170_s27, [#allocation6]  }
  0x32   : > { %s1107_s2 = sld [smem:[#allocation15_spill]] }
  0x38   : > { %s630_s5 = scalar_lea.hbm %s1107_s2, 64 }
  0x39   : > { %p631_p10 = scmp.ne.s32.totalorder %s1107_s2, %s630_s5  ;;  %p637_p5 = scmp.lt.u32.totalorder %s630_s5, %s1107_s2 }
  0x3b   : > { %p633_p1 = pnand %p631_p10, %p604_p11 }
  0x3d   : > { %p634_p3 = pneg %p633_p1 }
  0x3f   : > { %p639_p7 = pnand %p637_p5, %p634_p3 }
  0x41   : > { %642 = shalt.err (!%p639_p7)
}
  0x42   : > { %s643_s27 = scalar_lea.vmem %s893_s29, 64  ;;  %p651_p2 = scmp.lt.s32.totalorder %s893_s29, %s893_s29 }
  0x43   : > { %p644_p12 = scmp.ne.s32.totalorder %s893_s29, %s643_s27  ;;  %p652_p4 = scmp.lt.s32.totalorder %s643_s27, %s643_s27 }
  0x45   : > { %p646_p13 = pnand %p644_p12, %p604_p11  ;;  %p653_p6 = por %p652_p4, %p651_p2 }
  0x47   : > { %p647_p0 = pneg %p646_p13 }
  0x49   : > { %p654_p8 = pnand %p653_p6, %p647_p0 }
  0x4b   : > { %657 = shalt.err (!%p654_p8)
}
  0x4c   : > { %517 = dma.hbm_to_vmem [thread:$0]  (!%p889_p9), %s1107_s2, 64, %s893_s29, [#allocation6]  }
  0x4d   : > { %p141_p11 = scmp.eq.s32.totalorder %s471_s20, 3  ;;  %s32_s21 = sadd.s32 1, %s782_s17 }
  0x4e   : > { %p33_p10 = scmp.ge.s32.totalorder %s32_s21, 2  ;;  %s35_s30 = sadd.s32 1, %s786_s18 }
  0x4f   : > { %p55_p1 = scmp.ne.s32.totalorder %s770_s14, %s766_s13  ;;  %p56_p3 = scmp.eq.s32.totalorder %s790_s19, 0 }
  0x50   : > { %s1126_s21 = smov (%p33_p10, %s32_s21), 0  ;;  %s1128_s30 = smov (!%p33_p10, %s35_s30), %s786_s18 }
  0x51   : > { %1108 = sst [smem:[#allocation13_spill]] %s1126_s21  ;;  %s44_s26 = ssub.s32 %s782_s17, %s1126_s21 }
  0x52   : > { %s48_s28 = sadd.s32 1, %s770_s14  ;;  %p37_p5 = scmp.ge.s32.totalorder %s1128_s30, 2 }
  0x53   : > { %p955_p9 = por %p141_p11, %p55_p1  ;;  %p959_p7 = por %p56_p3, %p55_p1 }
  0x54   : > { %s193_s4 = sand.u32 1, %s770_s14   ;;  %s1130_s30 = smov (%p37_p5, %s1128_s30), 0 }
  0x55   : > { %p528_p12 = scmp.lt.s32.totalorder %s790_s19, 4  ;;  %s477_s5 = sshll.u32 %s193_s4, 2 }
  0x56   : > { %s43_s6 = ssub.s32 %s786_s18, %s1130_s30  ;;  %s478_s8 = sshll.u32 %s786_s18, 1 }
  0x57   : > { %s45_s7 = sor.u32 %s44_s26, %s43_s6  ;;  %s202_s9 = sadd.s32 %s782_s17, %s478_s8 }
  0x58   : > { %p46_p13 = scmp.eq.s32.totalorder %s45_s7, 0  ;;  %s479_s27 = sshll.u32 %s202_s9, 6 }
  0x59   : > { %s197_s10 = scalar_lea.vmem [#allocation2], %s477_s5  ;;  %s977_s24 = scalar_lea.hbm %s1088_s0, %s479_s27 }
  0x5a   : > { %s206_s11 = sshll.u32 %s197_s10, 4  ;;  %p985_p0 = pnand %p528_p12, %p959_p7  ;;  %s979_s11 = int_to_ptr.vmem [resolvable:$true] %s206_s11 }
  0x5b   : > { %s972_s1 = scalar_select %p46_p13, %s770_s14, %s48_s28  }
  0x5c   : > { %s194_s28 = scalar_lea.sflag [#allocation3], %s193_s4  ;;  %s658_s5 = scalar_lea.hbm %s977_s24, 64 }
  0x5d   : > { %p659_p2 = scmp.ne.s32.totalorder %s977_s24, %s658_s5  ;;  %p660_p4 = pneg %p985_p0 }
  0x5e   : > { %s663_s20 = scalar_lea.hbm %s1088_s0, 256  ;;  %p664_p11 = scmp.lt.u32.totalorder %s977_s24, %s1088_s0 }
  0x5f   : > { %p661_p6 = pnand %p660_p4, %p659_p2  ;;  %p665_p10 = scmp.lt.u32.totalorder %s663_s20, %s658_s5 }
  0x60   : > { %p667_p3 = scmp.lt.u32.totalorder %s658_s5, %s977_s24 }
  0x61   : > { %p662_p8 = pneg %p661_p6  ;;  %p666_p1 = por %p665_p10, %p664_p11 }
  0x63   : > { %p668_p5 = por %p667_p3, %p666_p1 }
  0x65   : > { %p669_p7 = pnand %p668_p5, %p662_p8 }
  0x67   : > { %672 = shalt.err (!%p669_p7)
}
  0x68   : > { %s673_s4 = scalar_lea.vmem %s979_s11, 64  ;;  %s794_s8 = smov [#allocation2]  }
  0x69   : > { %p674_p12 = scmp.ne.s32.totalorder %s979_s11, %s673_s4  ;;  %s678_s9 = sshll.u32 %s794_s8, 4  ;;  %s679_s9 = int_to_ptr.vmem [resolvable:$false] %s678_s9 }
  0x6a   : > { %s680_s27 = scalar_lea.vmem %s679_s9, 128  ;;  %p681_p6 = scmp.lt.s32.totalorder %s979_s11, %s679_s9 }
  0x6b   : > { %p676_p13 = pnand %p674_p12, %p660_p4  ;;  %p682_p11 = scmp.lt.s32.totalorder %s680_s27, %s673_s4 }
  0x6d   : > { %p677_p2 = pneg %p676_p13  ;;  %p683_p10 = por %p682_p11, %p681_p6 }
  0x6f   : > { %p684_p1 = pnand %p683_p10, %p677_p2 }
  0x71   : > { %687 = shalt.err (!%p684_p1)
}
  0x72   : > { %521 = dma.hbm_to_vmem [thread:$0]  (!%p985_p0), %s977_s24, 64, %s979_s11, %s194_s28  }
  0x73   : > { %p1112_p8 = scmp.ne.s32.totalorder %s1104_s25, 0 }
  0x74   : > { %s1017_s10 = sand.u32 (!%p1112_p8), 1, %s766_s13   ;;  %p1113_p4 = scmp.ne.s32.totalorder (!%p1112_p8), %s1101_s23, 0 }
  0x75   : > { %215 = sbr.rel (%p1112_p8) target bundleno = 361 (0x169), region = 32  ;;  %s481_s5 = sshll.u32 (!%p1112_p8), %s1017_s10, 2 }
  0x76   : > { %s218_s2 = scalar_lea.sflag (!%p1112_p8), [#allocation3], %s1017_s10  ;;  %s221_s21 = scalar_lea.vmem (!%p1112_p8), [#allocation2], %s481_s5 }
  0x7c   : > { %749 = dma.done.wait (%p1113_p4), %s218_s2, 64  }
  0x7d   : > { %751 = vsyncadd (%p1113_p4), %s218_s2, 4294967232  ;;  %p1114_p3 = scmp.ne.s32.totalorder %s1100_s22, 0 }
  0x7f   : > { %753 = dma.done.wait (%p1114_p3), [#allocation6], 128  }
  0x80   : > { %755 = vsyncadd (%p1114_p3), [#allocation6], 4294967168  ;;  %v795_v0 = vmov 0.0   ;;  %vm796_vm0 = vmmov 0   ;;  %v797_v1 = vmov 0   ;;  %vm265_vm1 = vcmask 1043456  }
  0x81   : > { %494 = vmatprep.subr.mxu0 %v795_v0  ;;  %496 = vmatprep.mubr.msk.f32.mxu0 %vm796_vm0, %v795_v0  ;;  %v252_v2 = vld [vmem:[%s221_s21] sm:$0xf]  ;;  %v255_v3 = vld [vmem:[#allocation7] sm:$0xf]  ;;  %v254_v5 = vld [vmem:[#allocation5] sm:$0xf] }
  0x82   : > { %601 = vset.pattern.permute.xlu0 %v797_v1  ;;  %v253_v4 = vmax.f32 %v252_v2, 0.0  ;;  %vm261_vm2 = vcmask 31744   ;;  %s488_s22 = sshll.u32 %s778_s16, 1  ;;  %s251_s25 = scalar_lea.vmem [#allocation8], %s481_s5 }
  0x83   : > { %258 = vperm.xlu0 %601, %v255_v3   ;;  %s354_s23 = sadd.s32 %s774_s15, %s488_s22  ;;  %s358_s11 = sshll.u32 %s251_s25, 4  ;;  %s1036_s11 = int_to_ptr.vmem [resolvable:$true] %s358_s11 }
  0x84   : > { %495 = vmatpush3.msk.msra.mxu0 %vm265_vm1, %v253_v4  ;;  %s489_s24 = sshll.u32 %s354_s23, 6  ;;  %s341_s16 = scalar_lea.sflag [#allocation4], %s1017_s10 }
  0x85   : > { %497 = vmatmul.mubr.msk.f32.vlgmr.msra.gmra.mrb[0].mxu0 %vm261_vm2, %v254_v5  ;;  %s1034_s20 = scalar_lea.hbm %s1091_s3, %s489_s24  ;;  %s688_s15 = scalar_lea.vmem %s1036_s11, 64 }
  0x86   : > { %p689_p0 = scmp.ne.s32.totalorder %s1036_s11, %s688_s15  ;;  %s798_s6 = smov [#allocation8]  }
  0x87   : > { %s692_s7 = sshll.u32 %s798_s6, 4  ;;  %s693_s7 = int_to_ptr.vmem [resolvable:$false] %s692_s7 }
  0x88   : > { %p690_p5 = pnand %p689_p0, %p955_p9  ;;  %s694_s4 = scalar_lea.vmem %s693_s7, 128 }
  0x89   : > { %p695_p12 = scmp.lt.s32.totalorder %s1036_s11, %s693_s7  ;;  %p696_p13 = scmp.lt.s32.totalorder %s694_s4, %s688_s15 }
  0x8a   : > { %p691_p7 = pneg %p690_p5 }
  0x8b   : > { %p697_p2 = por %p696_p13, %p695_p12 }
  0x8d   : > { %p698_p6 = pnand %p697_p2, %p691_p7 }
 0x102   : > { %v259_v6 = vpop.permute.xlu0 %258 }
 0x158   : > { %v335_v7 = vpop.f32.mrb[0].mxu0 }
 0x159   : > { %v336_v8 = vadd.f32 %v335_v7, %v259_v6  ;;  %v498_v9 = vpop.f32.mrb[1].mxu0 }
 0x15b   : > { %339 = vst [vmem:[%s251_s25] sm:$0xf] %v336_v8 }
 0x15c   : > { %701 = shalt.err (!%p698_p6)
}
 0x15d   : > { %s702_s8 = scalar_lea.hbm %s1034_s20, 64  ;;  %s706_s10 = scalar_lea.hbm %s1091_s3, 256 }
 0x15e   : > { %p703_p11 = scmp.ne.s32.totalorder %s1034_s20, %s702_s8  ;;  %p707_p8 = scmp.lt.u32.totalorder %s1034_s20, %s1091_s3 }
 0x15f   : > { %p708_p4 = scmp.lt.u32.totalorder %s706_s10, %s702_s8  ;;  %p710_p0 = scmp.lt.u32.totalorder %s702_s8, %s1034_s20 }
 0x160   : > { %p704_p10 = pnand %p703_p11, %p955_p9 }
 0x161   : > { %p709_p3 = por %p708_p4, %p707_p8 }
 0x162   : > { %p705_p1 = pneg %p704_p10 }
 0x163   : > { %p711_p5 = por %p710_p0, %p709_p3 }
 0x165   : > { %p712_p7 = pnand %p711_p5, %p705_p1 }
 0x167   : > { %715 = shalt.err (!%p712_p7)
}
 0x168   : > { %509 = dma.vmem_to_hbm [thread:$0]  (%p955_p9), %s1036_s11, 64, %s1034_s20, %s341_s16  }
 0x169 PF: > { %s1115_s21 = sld [smem:[#allocation12_spill]]  ;;  %p531_p12 = scmp.ge.s32.totalorder %s790_s19, 2 }
 0x16a   : > { %s370_s22 = sand.u32 1, %s762_s12  }
 0x16b   : > { %s371_s23 = scalar_lea.sflag [#allocation4], %s370_s22 }
 0x16f   : > { %p1116_p13 = scmp.ne.s32.totalorder %s1115_s21, 0 }
 0x171   : > { %p523_p2 = pnand %p531_p12, %p1116_p13 }
 0x173   : > { %757 = dma.done.wait (!%p523_p2), %s371_s23, 64  }
 0x174   : > { %759 = vsyncadd (!%p523_p2), %s371_s23, 4294967232  ;;  %s20_s19 = sadd.s32 1, %s790_s19   ;;  %s1117_s29 = sld [smem:[#allocation13_spill]] }
 0x175   : > { %p17_p6 = scmp.ge.s32.totalorder %s20_s19, 6   ;;  %s1118_s12 = smov %s766_s13 }
 0x176   : > { %s1119_s13 = smov %s770_s14  ;;  %s1120_s14 = smov %s972_s1 }
 0x177   : > { %s1121_s15 = smov %s782_s17  ;;  %s1122_s16 = smov %s786_s18 }
 0x178   : > { %s1124_s18 = smov %s1130_s30  ;;  %19 = sbr.rel (!%p17_p6) target bundleno = 11 (0xb), region = 87 }
 0x17a   : > { %s1123_s17 = smov %s1117_s29 }
 0x17f   :  { %376 = vsyncpa [#allocation3], 1 }
 0x180   :  { %378 = vsyncpa [#allocation3 + $0x1], 1 }
 0x181   :  { %379 = vsyncpa [#allocation6], 1 }
 0x182   :  { %380 = vsyncpa [#allocation4], 1 }
 0x183   :  { %382 = vsyncpa [#allocation4 + $0x1], 1 }

</bundles_post_ra>
